<compile_context>
chip_gen: v7x
topology: tpu7x:2x2x1
jax: 0.10.0
libtpu: 0.0.40
codegen_flags: <defaults>
</compile_context>

<pallas_src>
import functools

import jax
import jax.numpy as jnp
from jax.experimental import pallas as pl
from jax.experimental.pallas import tpu as pltpu


def _layer_norm(z, gamma, beta, eps):
    mu = jnp.mean(z, axis=-1, keepdims=True)
    var = jnp.mean((z - mu) ** 2, axis=-1, keepdims=True)
    return (z - mu) * jax.lax.rsqrt(var + eps) * gamma + beta


def transformer_classifier_kernel(
    x_ref, w_in_ref, b_in_ref, wl_ref, vl_ref, wfc_ref, bfc_ref, out_ref,
    *, num_layers, eps,
):
    f32 = jnp.float32
    w_in = w_in_ref[...]
    x = x_ref[...].astype(w_in.dtype)

    # x = self.linear(x)   (f32 accumulation on the MXU)
    y = jnp.dot(x, w_in, preferred_element_type=f32) + b_in_ref[...]

    # num_layers x TransformerEncoderLayer (post-norm, relu, dropout == identity).
    # Static unroll (L=2).  Per-layer weights: wl_ref[3l+0]=fused attention (Wv@Wo),
    # wl_ref[3l+1]=linear1, wl_ref[3l+2]=linear2.  Per-layer vectors (f32), loaded once:
    # [b_attn, b1, b2, g1, be1, g2, be2].
    for l in range(num_layers):
        w_attn = wl_ref[3 * l + 0]
        w1 = wl_ref[3 * l + 1]
        w2 = wl_ref[3 * l + 2]
        vec = vl_ref[l]                         # (7, H), loaded once per layer
        b_attn, b1, b2 = vec[0:1], vec[1:2], vec[2:3]
        g1, be1, g2, be2 = vec[3:4], vec[4:5], vec[5:6], vec[6:7]

        # --- self-attention block (seq_len == 1: softmax == 1, folded to one matmul)
        sa = jnp.dot(y.astype(w_attn.dtype), w_attn, preferred_element_type=f32) + b_attn
        y = _layer_norm(y + sa, g1, be1, eps)

        # --- feed-forward block
        h = jnp.dot(y.astype(w1.dtype), w1, preferred_element_type=f32) + b1
        h = jnp.maximum(h, 0.0)                 # relu
        ff = jnp.dot(h.astype(w2.dtype), w2, preferred_element_type=f32) + b2
        y = _layer_norm(y + ff, g2, be2, eps)

    # x.mean(dim=0) over length-1 sequence == identity; lane-dense (padded) fc head.
    wfc = wfc_ref[...]
    out = jnp.dot(y.astype(wfc.dtype), wfc, preferred_element_type=f32) + bfc_ref[...]
    out_ref[...] = out.astype(out_ref.dtype)


def fold_params(params, *, hidden_dim, num_layers, param_dtype=jnp.float32, lane=128):
    """Precompute (once, outside the kernel) the folded/packed/padded parameter set."""
    (w_in, b_in, wqkv, bqkv, wo, bo, w1, b1, w2, b2,
     g1, be1, g2, be2, wfc, bfc) = params
    H = hidden_dim
    C = wfc.shape[-1]

    # seq_len == 1  =>  attention output == V @ Wo + bo.  Fold V-proj into out-proj.
    wv = wqkv[:, :, 2 * H:3 * H]                          # (L, H, H)
    bv = bqkv[:, :, 2 * H:3 * H]                          # (L, 1, H)
    w_attn = jnp.einsum('lij,ljk->lik', wv, wo)           # (L, H, H)
    b_attn = jnp.einsum('lij,ljk->lik', bv, wo) + bo      # (L, 1, H)

    # Pack per-layer matrices into a single ref: (L*3, H, H) = [attn, ffn1, ffn2] per layer.
    wl = jnp.concatenate([
        jnp.stack([w_attn[l], w1[l], w2[l]]) for l in range(num_layers)
    ], axis=0).astype(param_dtype)
    # Pack per-layer vectors (kept f32 for the VPU path): (L, 7, H).
    vl = jnp.concatenate([b_attn, b1, b2, g1, be1, g2, be2], axis=1).astype(jnp.float32)

    # Lane-dense classifier head: pad output columns up to a multiple of 128.
    C_pad = ((C + lane - 1) // lane) * lane
    wfc_pad = jnp.zeros((H, C_pad), wfc.dtype).at[:, :C].set(wfc).astype(param_dtype)
    bfc_pad = jnp.zeros((1, C_pad), jnp.float32).at[:, :C].set(bfc)

    return (w_in.astype(param_dtype), b_in.astype(jnp.float32),
            wl, vl, wfc_pad, bfc_pad)


def _pick_batch_tile(B):
    # Largest tile (multiple of 8) that still leaves >= 2 parallel grid steps so the
    # two v7x TensorCores both get work; fall back to one full-batch step otherwise.
    for cand in (2048, 1024, 512, 256, 128, 64, 32, 16, 8):
        if B % cand == 0 and B // cand >= 2:
            return cand
    return B


def transformer_classifier(x, folded_params, num_classes, *, num_layers, eps=1e-5,
                           batch_tile=None):
    w_in, b_in, wl, vl, wfc_pad, bfc_pad = folded_params
    B, D_in = x.shape
    C_pad = wfc_pad.shape[-1]

    if batch_tile is None:
        batch_tile = _pick_batch_tile(B)
    assert B % batch_tile == 0

    # Weights/biases are small: pass each packed array as one full (grid-invariant) block.
    def full(a):
        nd = a.ndim
        return pl.BlockSpec(a.shape, lambda i, nd=nd: (0,) * nd)

    kernel = functools.partial(transformer_classifier_kernel,
                               num_layers=num_layers, eps=eps)

    out_pad = pl.pallas_call(
        kernel,
        out_shape=jax.ShapeDtypeStruct((B, C_pad), x.dtype),
        grid=(B // batch_tile,),
        in_specs=[
            pl.BlockSpec((batch_tile, D_in), lambda i: (i, 0)),
            full(w_in), full(b_in), full(wl), full(vl),
            full(wfc_pad), full(bfc_pad),
        ],
        out_specs=pl.BlockSpec((batch_tile, C_pad), lambda i: (i, 0)),
        compiler_params=pltpu.CompilerParams(dimension_semantics=("parallel",)),
    )(x, w_in, b_in, wl, vl, wfc_pad, bfc_pad)

    return out_pad[:, :num_classes]


def init_params(key, input_dim, hidden_dim, num_classes, num_layers):
    """Deterministic synthetic parameters matching the PyTorch module's shapes."""
    H = hidden_dim
    keys = iter(jax.random.split(key, 64))

    def w(shape, scale=0.05):
        return scale * jax.random.normal(next(keys), shape, jnp.float32)

    # PyTorch Linear weights are (out, in); transpose to (in, out) for y = x @ W + b.
    w_in = w((H, input_dim)).T                                           # (D_in, H)
    b_in = w((1, H))
    wqkv = jnp.stack([w((3 * H, H)).T for _ in range(num_layers)])       # (L, H, 3H)
    bqkv = jnp.stack([w((1, 3 * H)) for _ in range(num_layers)])         # (L, 1, 3H)
    wo = jnp.stack([w((H, H)).T for _ in range(num_layers)])             # (L, H, H)
    bo = jnp.stack([w((1, H)) for _ in range(num_layers)])
    w1 = jnp.stack([w((H, H)).T for _ in range(num_layers)])             # dim_feedforward == hidden_dim
    b1 = jnp.stack([w((1, H)) for _ in range(num_layers)])
    w2 = jnp.stack([w((H, H)).T for _ in range(num_layers)])
    b2 = jnp.stack([w((1, H)) for _ in range(num_layers)])
    g1 = jnp.ones((num_layers, 1, H), jnp.float32)                       # norm1 gamma
    be1 = jnp.zeros((num_layers, 1, H), jnp.float32)                     # norm1 beta
    g2 = jnp.ones((num_layers, 1, H), jnp.float32)
    be2 = jnp.zeros((num_layers, 1, H), jnp.float32)
    wfc = w((num_classes, H)).T                                          # (H, C)
    bfc = w((1, num_classes))
    return (w_in, b_in, wqkv, bqkv, wo, bo, w1, b1, w2, b2,
            g1, be1, g2, be2, wfc, bfc)


def reference(x, params, *, num_layers, hidden_dim, eps=1e-5):
    """Pure-JAX reference of the PyTorch forward (eval mode)."""
    (w_in, b_in, wqkv, bqkv, wo, bo, w1, b1, w2, b2,
     g1, be1, g2, be2, wfc, bfc) = params
    H = hidden_dim

    def ln(z, g, b):
        mu = z.mean(-1, keepdims=True)
        var = ((z - mu) ** 2).mean(-1, keepdims=True)
        return (z - mu) / jnp.sqrt(var + eps) * g + b

    y = x @ w_in + b_in
    for l in range(num_layers):
        qkv = y @ wqkv[l] + bqkv[l]
        v = qkv[:, 2 * H:]
        sa = v @ wo[l] + bo[l]          # softmax over seq_len=1 is identically 1
        y = ln(y + sa, g1[l], be1[l])
        h = jnp.maximum(y @ w1[l] + b1[l], 0.0)
        ff = h @ w2[l] + b2[l]
        y = ln(y + ff, g2[l], be2[l])
    return y @ wfc + bfc


if __name__ == "__main__":
    input_dim, hidden_dim, num_classes = 16, 32, 8
    num_heads, num_layers = 4, 2   # num_heads only constrains shapes; seq_len=1 folds heads away
    B = 16

    key = jax.random.PRNGKey(0)
    kx, kp = jax.random.split(key)
    x = jax.random.normal(kx, (B, input_dim), jnp.float32)
    params = init_params(kp, input_dim, hidden_dim, num_classes, num_layers)

    # f32 path (tight correctness check vs. pure-JAX reference of the PyTorch forward).
    folded = fold_params(params, hidden_dim=hidden_dim, num_layers=num_layers)
    out = transformer_classifier(x, folded, num_classes, num_layers=num_layers)
    out = jax.block_until_ready(out)

    ref = reference(x, params, num_layers=num_layers, hidden_dim=hidden_dim)
    assert out.shape == (B, num_classes)
    max_err = float(jnp.max(jnp.abs(out - ref)))
    assert jnp.allclose(out, ref, atol=1e-4, rtol=1e-4), f"max_err={max_err}"

    # bf16-weight path (v6e/v7x MXU fast path; f32 accumulation + f32 LayerNorm).
    folded_bf16 = fold_params(params, hidden_dim=hidden_dim, num_layers=num_layers,
                              param_dtype=jnp.bfloat16)
    out_bf16 = jax.block_until_ready(
        transformer_classifier(x, folded_bf16, num_classes, num_layers=num_layers))
    assert out_bf16.shape == (B, num_classes)
    assert bool(jnp.all(jnp.isfinite(out_bf16)))

    print("KERNEL_OK")
</pallas_src>

<mosaic_0001>
module attributes {stable_mosaic.version = 11 : i64} {
  func.func @transformer_classifier_kernel(%arg0: i32, %arg1: memref<8x16xf32, #tpu.memory_space<vmem>>, %arg2: memref<16x32xf32, #tpu.memory_space<vmem>>, %arg3: memref<1x32xf32, #tpu.memory_space<vmem>>, %arg4: memref<6x32x32xf32, #tpu.memory_space<vmem>>, %arg5: memref<2x7x32xf32, #tpu.memory_space<vmem>>, %arg6: memref<32x128xf32, #tpu.memory_space<vmem>>, %arg7: memref<1x128xf32, #tpu.memory_space<vmem>>, %arg8: memref<8x128xf32, #tpu.memory_space<vmem>>) attributes {dimension_semantics = [#tpu.dimension_semantics<parallel>], iteration_bounds = array<i64: 2>, scalar_prefetch = 0 : i64, scratch_operands = 0 : i64, tpu.core_type = #tpu.core_type<tc>, window_params = [{transform_indices = @transform_0, window_bounds = array<i64: 8, 16>}, {pipeline_mode = #tpu.pipeline_mode<synchronous>, transform_indices = @transform_1, window_bounds = array<i64: 16, 32>}, {pipeline_mode = #tpu.pipeline_mode<synchronous>, transform_indices = @transform_2, window_bounds = array<i64: 1, 32>}, {pipeline_mode = #tpu.pipeline_mode<synchronous>, transform_indices = @transform_3, window_bounds = array<i64: 6, 32, 32>}, {pipeline_mode = #tpu.pipeline_mode<synchronous>, transform_indices = @transform_4, window_bounds = array<i64: 2, 7, 32>}, {pipeline_mode = #tpu.pipeline_mode<synchronous>, transform_indices = @transform_5, window_bounds = array<i64: 32, 128>}, {pipeline_mode = #tpu.pipeline_mode<synchronous>, transform_indices = @transform_6, window_bounds = array<i64: 1, 128>}, {transform_indices = @transform_7, window_bounds = array<i64: 8, 128>}]} {
    %c0 = arith.constant 0 : index
    %c0_0 = arith.constant 0 : index
    %0 = vector.load %arg2[%c0, %c0_0] : memref<16x32xf32, #tpu.memory_space<vmem>>, vector<16x32xf32>
    %c0_1 = arith.constant 0 : index
    %c0_2 = arith.constant 0 : index
    %1 = vector.load %arg1[%c0_1, %c0_2] : memref<8x16xf32, #tpu.memory_space<vmem>>, vector<8x16xf32>
    %cst = arith.constant dense<0.000000e+00> : vector<8x32xf32>
    %2 = tpu.matmul %1, %0, %cst {dimension_numbers = #tpu.dot_dimension_numbers<[1], [0], [0], [1], [0, 0, 1, 1], [], []>} : vector<8x16xf32>, vector<16x32xf32>, vector<8x32xf32> -> vector<8x32xf32>
    %c0_3 = arith.constant 0 : index
    %c0_4 = arith.constant 0 : index
    %3 = vector.load %arg3[%c0_3, %c0_4] : memref<1x32xf32, #tpu.memory_space<vmem>>, vector<1x32xf32>
    %4 = vector.broadcast %3 : vector<1x32xf32> to vector<8x32xf32>
    %5 = arith.addf %2, %4 : vector<8x32xf32>
    %c0_5 = arith.constant 0 : index
    %c0_6 = arith.constant 0 : index
    %c0_7 = arith.constant 0 : index
    %6 = vector.load %arg4[%c0_5, %c0_6, %c0_7] : memref<6x32x32xf32, #tpu.memory_space<vmem>>, vector<1x32x32xf32>
    %7 = vector.shape_cast %6 : vector<1x32x32xf32> to vector<32x32xf32>
    %c1 = arith.constant 1 : index
    %c0_8 = arith.constant 0 : index
    %c0_9 = arith.constant 0 : index
    %8 = vector.load %arg4[%c1, %c0_8, %c0_9] : memref<6x32x32xf32, #tpu.memory_space<vmem>>, vector<1x32x32xf32>
    %9 = vector.shape_cast %8 : vector<1x32x32xf32> to vector<32x32xf32>
    %c2 = arith.constant 2 : index
    %c0_10 = arith.constant 0 : index
    %c0_11 = arith.constant 0 : index
    %10 = vector.load %arg4[%c2, %c0_10, %c0_11] : memref<6x32x32xf32, #tpu.memory_space<vmem>>, vector<1x32x32xf32>
    %11 = vector.shape_cast %10 : vector<1x32x32xf32> to vector<32x32xf32>
    %c0_12 = arith.constant 0 : index
    %c0_13 = arith.constant 0 : index
    %c0_14 = arith.constant 0 : index
    %12 = vector.load %arg5[%c0_12, %c0_13, %c0_14] : memref<2x7x32xf32, #tpu.memory_space<vmem>>, vector<1x7x32xf32>
    %13 = vector.shape_cast %12 : vector<1x7x32xf32> to vector<7x32xf32>
    %14 = vector.extract_strided_slice %13 {offsets = [0, 0], sizes = [1, 32], strides = [1, 1]} : vector<7x32xf32> to vector<1x32xf32>
    %15 = vector.extract_strided_slice %13 {offsets = [1, 0], sizes = [1, 32], strides = [1, 1]} : vector<7x32xf32> to vector<1x32xf32>
    %16 = vector.extract_strided_slice %13 {offsets = [2, 0], sizes = [1, 32], strides = [1, 1]} : vector<7x32xf32> to vector<1x32xf32>
    %17 = vector.extract_strided_slice %13 {offsets = [3, 0], sizes = [1, 32], strides = [1, 1]} : vector<7x32xf32> to vector<1x32xf32>
    %18 = vector.extract_strided_slice %13 {offsets = [4, 0], sizes = [1, 32], strides = [1, 1]} : vector<7x32xf32> to vector<1x32xf32>
    %19 = vector.extract_strided_slice %13 {offsets = [5, 0], sizes = [1, 32], strides = [1, 1]} : vector<7x32xf32> to vector<1x32xf32>
    %20 = vector.extract_strided_slice %13 {offsets = [6, 0], sizes = [1, 32], strides = [1, 1]} : vector<7x32xf32> to vector<1x32xf32>
    %cst_15 = arith.constant dense<0.000000e+00> : vector<8x32xf32>
    %21 = tpu.matmul %5, %7, %cst_15 {dimension_numbers = #tpu.dot_dimension_numbers<[1], [0], [0], [1], [0, 0, 1, 1], [], []>} : vector<8x32xf32>, vector<32x32xf32>, vector<8x32xf32> -> vector<8x32xf32>
    %22 = vector.broadcast %14 : vector<1x32xf32> to vector<8x32xf32>
    %23 = arith.addf %21, %22 : vector<8x32xf32>
    %24 = arith.addf %5, %23 : vector<8x32xf32>
    %cst_16 = arith.constant dense<0.000000e+00> : vector<8xf32>
    %25 = vector.multi_reduction <add>, %24, %cst_16 [1] : vector<8x32xf32> to vector<8xf32>
    %26 = vector.shape_cast %25 : vector<8xf32> to vector<8x1xf32>
    %cst_17 = arith.constant 3.200000e+01 : f32
    %27 = vector.broadcast %cst_17 : f32 to vector<8x1xf32>
    %28 = arith.divf %26, %27 : vector<8x1xf32>
    %29 = vector.broadcast %28 : vector<8x1xf32> to vector<8x32xf32>
    %30 = arith.subf %24, %29 : vector<8x32xf32>
    %31 = arith.mulf %30, %30 : vector<8x32xf32>
    %cst_18 = arith.constant dense<0.000000e+00> : vector<8xf32>
    %32 = vector.multi_reduction <add>, %31, %cst_18 [1] : vector<8x32xf32> to vector<8xf32>
    %33 = vector.shape_cast %32 : vector<8xf32> to vector<8x1xf32>
    %cst_19 = arith.constant 3.200000e+01 : f32
    %34 = vector.broadcast %cst_19 : f32 to vector<8x1xf32>
    %35 = arith.divf %33, %34 : vector<8x1xf32>
    %36 = vector.broadcast %28 : vector<8x1xf32> to vector<8x32xf32>
    %37 = arith.subf %24, %36 : vector<8x32xf32>
    %cst_20 = arith.constant 9.99999974E-6 : f32
    %38 = vector.broadcast %cst_20 : f32 to vector<8x1xf32>
    %39 = arith.addf %35, %38 : vector<8x1xf32>
    %40 = math.rsqrt %39 : vector<8x1xf32>
    %41 = vector.broadcast %40 : vector<8x1xf32> to vector<8x32xf32>
    %42 = arith.mulf %37, %41 : vector<8x32xf32>
    %43 = vector.broadcast %17 : vector<1x32xf32> to vector<8x32xf32>
    %44 = arith.mulf %42, %43 : vector<8x32xf32>
    %45 = vector.broadcast %18 : vector<1x32xf32> to vector<8x32xf32>
    %46 = arith.addf %44, %45 : vector<8x32xf32>
    %cst_21 = arith.constant dense<0.000000e+00> : vector<8x32xf32>
    %47 = tpu.matmul %46, %9, %cst_21 {dimension_numbers = #tpu.dot_dimension_numbers<[1], [0], [0], [1], [0, 0, 1, 1], [], []>} : vector<8x32xf32>, vector<32x32xf32>, vector<8x32xf32> -> vector<8x32xf32>
    %48 = vector.broadcast %15 : vector<1x32xf32> to vector<8x32xf32>
    %49 = arith.addf %47, %48 : vector<8x32xf32>
    %cst_22 = arith.constant 0.000000e+00 : f32
    %50 = vector.broadcast %cst_22 : f32 to vector<8x32xf32>
    %51 = arith.maximumf %49, %50 : vector<8x32xf32>
    %cst_23 = arith.constant dense<0.000000e+00> : vector<8x32xf32>
    %52 = tpu.matmul %51, %11, %cst_23 {dimension_numbers = #tpu.dot_dimension_numbers<[1], [0], [0], [1], [0, 0, 1, 1], [], []>} : vector<8x32xf32>, vector<32x32xf32>, vector<8x32xf32> -> vector<8x32xf32>
    %53 = vector.broadcast %16 : vector<1x32xf32> to vector<8x32xf32>
    %54 = arith.addf %52, %53 : vector<8x32xf32>
    %55 = arith.addf %46, %54 : vector<8x32xf32>
    %cst_24 = arith.constant dense<0.000000e+00> : vector<8xf32>
    %56 = vector.multi_reduction <add>, %55, %cst_24 [1] : vector<8x32xf32> to vector<8xf32>
    %57 = vector.shape_cast %56 : vector<8xf32> to vector<8x1xf32>
    %cst_25 = arith.constant 3.200000e+01 : f32
    %58 = vector.broadcast %cst_25 : f32 to vector<8x1xf32>
    %59 = arith.divf %57, %58 : vector<8x1xf32>
    %60 = vector.broadcast %59 : vector<8x1xf32> to vector<8x32xf32>
    %61 = arith.subf %55, %60 : vector<8x32xf32>
    %62 = arith.mulf %61, %61 : vector<8x32xf32>
    %cst_26 = arith.constant dense<0.000000e+00> : vector<8xf32>
    %63 = vector.multi_reduction <add>, %62, %cst_26 [1] : vector<8x32xf32> to vector<8xf32>
    %64 = vector.shape_cast %63 : vector<8xf32> to vector<8x1xf32>
    %cst_27 = arith.constant 3.200000e+01 : f32
    %65 = vector.broadcast %cst_27 : f32 to vector<8x1xf32>
    %66 = arith.divf %64, %65 : vector<8x1xf32>
    %67 = vector.broadcast %59 : vector<8x1xf32> to vector<8x32xf32>
    %68 = arith.subf %55, %67 : vector<8x32xf32>
    %cst_28 = arith.constant 9.99999974E-6 : f32
    %69 = vector.broadcast %cst_28 : f32 to vector<8x1xf32>
    %70 = arith.addf %66, %69 : vector<8x1xf32>
    %71 = math.rsqrt %70 : vector<8x1xf32>
    %72 = vector.broadcast %71 : vector<8x1xf32> to vector<8x32xf32>
    %73 = arith.mulf %68, %72 : vector<8x32xf32>
    %74 = vector.broadcast %19 : vector<1x32xf32> to vector<8x32xf32>
    %75 = arith.mulf %73, %74 : vector<8x32xf32>
    %76 = vector.broadcast %20 : vector<1x32xf32> to vector<8x32xf32>
    %77 = arith.addf %75, %76 : vector<8x32xf32>
    %c3 = arith.constant 3 : index
    %c0_29 = arith.constant 0 : index
    %c0_30 = arith.constant 0 : index
    %78 = vector.load %arg4[%c3, %c0_29, %c0_30] : memref<6x32x32xf32, #tpu.memory_space<vmem>>, vector<1x32x32xf32>
    %79 = vector.shape_cast %78 : vector<1x32x32xf32> to vector<32x32xf32>
    %c4 = arith.constant 4 : index
    %c0_31 = arith.constant 0 : index
    %c0_32 = arith.constant 0 : index
    %80 = vector.load %arg4[%c4, %c0_31, %c0_32] : memref<6x32x32xf32, #tpu.memory_space<vmem>>, vector<1x32x32xf32>
    %81 = vector.shape_cast %80 : vector<1x32x32xf32> to vector<32x32xf32>
    %c5 = arith.constant 5 : index
    %c0_33 = arith.constant 0 : index
    %c0_34 = arith.constant 0 : index
    %82 = vector.load %arg4[%c5, %c0_33, %c0_34] : memref<6x32x32xf32, #tpu.memory_space<vmem>>, vector<1x32x32xf32>
    %83 = vector.shape_cast %82 : vector<1x32x32xf32> to vector<32x32xf32>
    %c1_35 = arith.constant 1 : index
    %c0_36 = arith.constant 0 : index
    %c0_37 = arith.constant 0 : index
    %84 = vector.load %arg5[%c1_35, %c0_36, %c0_37] : memref<2x7x32xf32, #tpu.memory_space<vmem>>, vector<1x7x32xf32>
    %85 = vector.shape_cast %84 : vector<1x7x32xf32> to vector<7x32xf32>
    %86 = vector.extract_strided_slice %85 {offsets = [0, 0], sizes = [1, 32], strides = [1, 1]} : vector<7x32xf32> to vector<1x32xf32>
    %87 = vector.extract_strided_slice %85 {offsets = [1, 0], sizes = [1, 32], strides = [1, 1]} : vector<7x32xf32> to vector<1x32xf32>
    %88 = vector.extract_strided_slice %85 {offsets = [2, 0], sizes = [1, 32], strides = [1, 1]} : vector<7x32xf32> to vector<1x32xf32>
    %89 = vector.extract_strided_slice %85 {offsets = [3, 0], sizes = [1, 32], strides = [1, 1]} : vector<7x32xf32> to vector<1x32xf32>
    %90 = vector.extract_strided_slice %85 {offsets = [4, 0], sizes = [1, 32], strides = [1, 1]} : vector<7x32xf32> to vector<1x32xf32>
    %91 = vector.extract_strided_slice %85 {offsets = [5, 0], sizes = [1, 32], strides = [1, 1]} : vector<7x32xf32> to vector<1x32xf32>
    %92 = vector.extract_strided_slice %85 {offsets = [6, 0], sizes = [1, 32], strides = [1, 1]} : vector<7x32xf32> to vector<1x32xf32>
    %cst_38 = arith.constant dense<0.000000e+00> : vector<8x32xf32>
    %93 = tpu.matmul %77, %79, %cst_38 {dimension_numbers = #tpu.dot_dimension_numbers<[1], [0], [0], [1], [0, 0, 1, 1], [], []>} : vector<8x32xf32>, vector<32x32xf32>, vector<8x32xf32> -> vector<8x32xf32>
    %94 = vector.broadcast %86 : vector<1x32xf32> to vector<8x32xf32>
    %95 = arith.addf %93, %94 : vector<8x32xf32>
    %96 = arith.addf %77, %95 : vector<8x32xf32>
    %cst_39 = arith.constant dense<0.000000e+00> : vector<8xf32>
    %97 = vector.multi_reduction <add>, %96, %cst_39 [1] : vector<8x32xf32> to vector<8xf32>
    %98 = vector.shape_cast %97 : vector<8xf32> to vector<8x1xf32>
    %cst_40 = arith.constant 3.200000e+01 : f32
    %99 = vector.broadcast %cst_40 : f32 to vector<8x1xf32>
    %100 = arith.divf %98, %99 : vector<8x1xf32>
    %101 = vector.broadcast %100 : vector<8x1xf32> to vector<8x32xf32>
    %102 = arith.subf %96, %101 : vector<8x32xf32>
    %103 = arith.mulf %102, %102 : vector<8x32xf32>
    %cst_41 = arith.constant dense<0.000000e+00> : vector<8xf32>
    %104 = vector.multi_reduction <add>, %103, %cst_41 [1] : vector<8x32xf32> to vector<8xf32>
    %105 = vector.shape_cast %104 : vector<8xf32> to vector<8x1xf32>
    %cst_42 = arith.constant 3.200000e+01 : f32
    %106 = vector.broadcast %cst_42 : f32 to vector<8x1xf32>
    %107 = arith.divf %105, %106 : vector<8x1xf32>
    %108 = vector.broadcast %100 : vector<8x1xf32> to vector<8x32xf32>
    %109 = arith.subf %96, %108 : vector<8x32xf32>
    %cst_43 = arith.constant 9.99999974E-6 : f32
    %110 = vector.broadcast %cst_43 : f32 to vector<8x1xf32>
    %111 = arith.addf %107, %110 : vector<8x1xf32>
    %112 = math.rsqrt %111 : vector<8x1xf32>
    %113 = vector.broadcast %112 : vector<8x1xf32> to vector<8x32xf32>
    %114 = arith.mulf %109, %113 : vector<8x32xf32>
    %115 = vector.broadcast %89 : vector<1x32xf32> to vector<8x32xf32>
    %116 = arith.mulf %114, %115 : vector<8x32xf32>
    %117 = vector.broadcast %90 : vector<1x32xf32> to vector<8x32xf32>
    %118 = arith.addf %116, %117 : vector<8x32xf32>
    %cst_44 = arith.constant dense<0.000000e+00> : vector<8x32xf32>
    %119 = tpu.matmul %118, %81, %cst_44 {dimension_numbers = #tpu.dot_dimension_numbers<[1], [0], [0], [1], [0, 0, 1, 1], [], []>} : vector<8x32xf32>, vector<32x32xf32>, vector<8x32xf32> -> vector<8x32xf32>
    %120 = vector.broadcast %87 : vector<1x32xf32> to vector<8x32xf32>
    %121 = arith.addf %119, %120 : vector<8x32xf32>
    %cst_45 = arith.constant 0.000000e+00 : f32
    %122 = vector.broadcast %cst_45 : f32 to vector<8x32xf32>
    %123 = arith.maximumf %121, %122 : vector<8x32xf32>
    %cst_46 = arith.constant dense<0.000000e+00> : vector<8x32xf32>
    %124 = tpu.matmul %123, %83, %cst_46 {dimension_numbers = #tpu.dot_dimension_numbers<[1], [0], [0], [1], [0, 0, 1, 1], [], []>} : vector<8x32xf32>, vector<32x32xf32>, vector<8x32xf32> -> vector<8x32xf32>
    %125 = vector.broadcast %88 : vector<1x32xf32> to vector<8x32xf32>
    %126 = arith.addf %124, %125 : vector<8x32xf32>
    %127 = arith.addf %118, %126 : vector<8x32xf32>
    %cst_47 = arith.constant dense<0.000000e+00> : vector<8xf32>
    %128 = vector.multi_reduction <add>, %127, %cst_47 [1] : vector<8x32xf32> to vector<8xf32>
    %129 = vector.shape_cast %128 : vector<8xf32> to vector<8x1xf32>
    %cst_48 = arith.constant 3.200000e+01 : f32
    %130 = vector.broadcast %cst_48 : f32 to vector<8x1xf32>
    %131 = arith.divf %129, %130 : vector<8x1xf32>
    %132 = vector.broadcast %131 : vector<8x1xf32> to vector<8x32xf32>
    %133 = arith.subf %127, %132 : vector<8x32xf32>
    %134 = arith.mulf %133, %133 : vector<8x32xf32>
    %cst_49 = arith.constant dense<0.000000e+00> : vector<8xf32>
    %135 = vector.multi_reduction <add>, %134, %cst_49 [1] : vector<8x32xf32> to vector<8xf32>
    %136 = vector.shape_cast %135 : vector<8xf32> to vector<8x1xf32>
    %cst_50 = arith.constant 3.200000e+01 : f32
    %137 = vector.broadcast %cst_50 : f32 to vector<8x1xf32>
    %138 = arith.divf %136, %137 : vector<8x1xf32>
    %139 = vector.broadcast %131 : vector<8x1xf32> to vector<8x32xf32>
    %140 = arith.subf %127, %139 : vector<8x32xf32>
    %cst_51 = arith.constant 9.99999974E-6 : f32
    %141 = vector.broadcast %cst_51 : f32 to vector<8x1xf32>
    %142 = arith.addf %138, %141 : vector<8x1xf32>
    %143 = math.rsqrt %142 : vector<8x1xf32>
    %144 = vector.broadcast %143 : vector<8x1xf32> to vector<8x32xf32>
    %145 = arith.mulf %140, %144 : vector<8x32xf32>
    %146 = vector.broadcast %91 : vector<1x32xf32> to vector<8x32xf32>
    %147 = arith.mulf %145, %146 : vector<8x32xf32>
    %148 = vector.broadcast %92 : vector<1x32xf32> to vector<8x32xf32>
    %149 = arith.addf %147, %148 : vector<8x32xf32>
    %c0_52 = arith.constant 0 : index
    %c0_53 = arith.constant 0 : index
    %150 = vector.load %arg6[%c0_52, %c0_53] : memref<32x128xf32, #tpu.memory_space<vmem>>, vector<32x128xf32>
    %cst_54 = arith.constant dense<0.000000e+00> : vector<8x128xf32>
    %151 = tpu.matmul %149, %150, %cst_54 {dimension_numbers = #tpu.dot_dimension_numbers<[1], [0], [0], [1], [0, 0, 1, 1], [], []>} : vector<8x32xf32>, vector<32x128xf32>, vector<8x128xf32> -> vector<8x128xf32>
    %c0_55 = arith.constant 0 : index
    %c0_56 = arith.constant 0 : index
    %152 = vector.load %arg7[%c0_55, %c0_56] : memref<1x128xf32, #tpu.memory_space<vmem>>, vector<1x128xf32>
    %153 = vector.broadcast %152 : vector<1x128xf32> to vector<8x128xf32>
    %154 = arith.addf %151, %153 : vector<8x128xf32>
    %c0_57 = arith.constant 0 : index
    %c0_58 = arith.constant 0 : index
    %155 = vector.load %arg8[%c0_57, %c0_58] : memref<8x128xf32, #tpu.memory_space<vmem>>, vector<8x128xf32>
    tpu.vector_store %arg8[%c0_57, %c0_58], %154 {strides = array<i32>} : memref<8x128xf32, #tpu.memory_space<vmem>>, vector<8x128xf32>,
    return
  }
  func.func @transform_0(%arg0: i32) -> (i32, i32) {
    %c0_i32 = arith.constant 0 : i32
    %c0_i32_0 = arith.constant 0 : i32
    return %arg0, %c0_i32 : i32, i32
  }
  func.func @transform_1(%arg0: i32) -> (i32, i32) {
    %c0_i32 = arith.constant 0 : i32
    %c0_i32_0 = arith.constant 0 : i32
    %c0_i32_1 = arith.constant 0 : i32
    return %c0_i32, %c0_i32_0 : i32, i32
  }
  func.func @transform_2(%arg0: i32) -> (i32, i32) {
    %c0_i32 = arith.constant 0 : i32
    %c0_i32_0 = arith.constant 0 : i32
    %c0_i32_1 = arith.constant 0 : i32
    return %c0_i32, %c0_i32_0 : i32, i32
  }
  func.func @transform_3(%arg0: i32) -> (i32, i32, i32) {
    %c0_i32 = arith.constant 0 : i32
    %c0_i32_0 = arith.constant 0 : i32
    %c0_i32_1 = arith.constant 0 : i32
    %c0_i32_2 = arith.constant 0 : i32
    return %c0_i32, %c0_i32_0, %c0_i32_1 : i32, i32, i32
  }
  func.func @transform_4(%arg0: i32) -> (i32, i32, i32) {
    %c0_i32 = arith.constant 0 : i32
    %c0_i32_0 = arith.constant 0 : i32
    %c0_i32_1 = arith.constant 0 : i32
    %c0_i32_2 = arith.constant 0 : i32
    return %c0_i32, %c0_i32_0, %c0_i32_1 : i32, i32, i32
  }
  func.func @transform_5(%arg0: i32) -> (i32, i32) {
    %c0_i32 = arith.constant 0 : i32
    %c0_i32_0 = arith.constant 0 : i32
    %c0_i32_1 = arith.constant 0 : i32
    return %c0_i32, %c0_i32_0 : i32, i32
  }
  func.func @transform_6(%arg0: i32) -> (i32, i32) {
    %c0_i32 = arith.constant 0 : i32
    %c0_i32_0 = arith.constant 0 : i32
    %c0_i32_1 = arith.constant 0 : i32
    return %c0_i32, %c0_i32_0 : i32, i32
  }
  func.func @transform_7(%arg0: i32) -> (i32, i32) {
    %c0_i32 = arith.constant 0 : i32
    %c0_i32_0 = arith.constant 0 : i32
    return %arg0, %c0_i32 : i32, i32
  }
}

</mosaic_0001>

<bundles_post_ra>
// kernel: tpu_custom_call.1
= control target key start
LH: loop header
LB: loop body
LE: loop exit
PB: predicated region body
PF: predicated region fallthrough
CT: control target
= control target key end

     0   :  { %s1980_s0 = inlined_call_operand.vmem [shape: f32[16,16], index: 0, kind: input, shape index: {}]   ;;  %s1981_s1 = inlined_call_operand.hbm [shape: f32[16,32], index: 1, kind: input, shape index: {}]   ;;  %s1982_s2 = inlined_call_operand.hbm [shape: f32[1,32], index: 2, kind: input, shape index: {}]   ;;  %s1983_s3 = inlined_call_operand.hbm [shape: f32[6,32,32], index: 3, kind: input, shape index: {}]   ;;  %s1984_s4 = inlined_call_operand.vmem [shape: f32[2,7,32], index: 4, kind: input, shape index: {}]   ;;  %s1985_s5 = inlined_call_operand.vmem [shape: f32[32,128], index: 5, kind: input, shape index: {}]   ;;  %s1986_s6 = inlined_call_operand.vmem [shape: f32[1,128], index: 6, kind: input, shape index: {}]   ;;  %s1987_s7 = inlined_call_operand.hbm [shape: f32[16,128], index: 7, kind: output, shape index: {}]  }
   0x1   :  { %1991 = sst [smem:[#allocation13_spill]] %s1982_s2 }
   0x2   :  { %12 = vsyncpa [#allocation3], 0 }
   0x3   :  { %13 = vsyncpa [#allocation6], 0 }
   0x4   :  { %14 = vsyncpa [#allocation4], 0 }
   0x5   :  { %16 = vsyncpa [#allocation4 + $0x1], 0  ;;  %s1665_s24 = smov 0   ;;  %s1667_s25 = smov 0  }
   0x6   :  { %s1669_s26 = smov 0   ;;  %s1671_s27 = smov 0  }
   0x7 LB: > { %s1686_s28 = sadd.s32 4294967295, %s1614_s27   ;;  %s1183_s29 = sadd.s32 4294967294, %s1614_s27   ;;  %s1614_s27 = sphi %s1671_s27, %s2010_s27   ;;  %s1610_s26 = sphi %s1669_s26, %s2009_s26   ;;  %s1606_s25 = sphi %s1667_s25, %s2008_s25   ;;  %s1602_s24 = sphi %s1665_s24, %s2007_s24  }
   0x8   : > { %s1690_s30 = sadd.s32 1, %s1614_s27   ;;  %s181_s8 = sadd.s32 1, %s1610_s26 }
   0x9   : > { %s178_s9 = ssub.s32 %s1614_s27, %s1690_s30  ;;  %p191_p0 = scmp.ne.s32.totalorder %s1610_s26, %s1606_s25 }
   0xa   : > { %p179_p1 = scmp.eq.s32.totalorder %s178_s9, 0  ;;  %p192_p2 = scmp.eq.s32.totalorder %s1686_s28, 1 }
   0xb   : > { %p197_p3 = scmp.ne.s32.totalorder %s1606_s25, %s1602_s24  ;;  %p198_p4 = scmp.eq.s32.totalorder %s1183_s29, 1 }
   0xc   : > { %s1701_s10 = scalar_select %p179_p1, %s1610_s26, %s181_s8  }
   0xd   : > { %p1703_p5 = por %p192_p2, %p191_p0  ;;  %p1707_p6 = por %p198_p4, %p197_p3 }
   0xe   : > { %1992 = sst [smem:[#allocation12_spill]] %s1701_s10  ;;  %p1184_p7 = scmp.ge.s32.totalorder %s1614_s27, 1 }
   0xf   : > { %s1993_s11 = scalar_select %p1703_p5, 1, 0 }
  0x10   : > { %s1994_s12 = scalar_select %p1707_p6, 1, 0 }
  0x11   : > { %p205_p8 = scmp.lt.s32.totalorder %s1614_s27, 3  ;;  %p1988_p9 = scmp.eq.s32.totalorder %s1686_s28, 0 }
  0x12   : > { %s1616_s14 = smov [#allocation5]   ;;  %s1617_s16 = smov [#allocation2]  }
  0x13   : > { %p1714_p10 = pnand %p1184_p7, %p205_p8  ;;  %s231_s15 = sshll.u32 %s1616_s14, 4  ;;  %s232_s15 = int_to_ptr.vmem [resolvable:$true] %s231_s15 }
  0x14   : > { %s217_s17 = sshll.u32 %s1617_s16, 4  ;;  %s1618_s19 = smov [#allocation7]   ;;  %s1726_s17 = int_to_ptr.vmem [resolvable:$true] %s217_s17 }
  0x15   : > { %s1995_s13 = scalar_select %p1714_p10, 1, 0 }
  0x16   : > { %p1391_p11 = pneg %p1714_p10  ;;  %s1728_s20 = sshll.u32 %s1618_s19, 4  ;;  %s242_s20 = int_to_ptr.vmem [resolvable:$true] %s1728_s20 }
  0x17   : > { %s1997_s2 = sld [smem:[#allocation13_spill]] }
  0x18   : > { %p1722_p12 = pnand %p1988_p9, %p1391_p11 }
  0x1a   : > { %p1738_p0 = pneg %p1722_p12 }
  0x1d   : > { %s1460_s23 = scalar_lea.hbm %s1997_s2, 16 }
  0x1e   : > { %p1461_p13 = scmp.ne.s32.totalorder %s1997_s2, %s1460_s23  ;;  %p1467_p3 = scmp.lt.u32.totalorder %s1460_s23, %s1997_s2 }
  0x20   : > { %p1463_p1 = pnand %p1738_p0, %p1461_p13 }
  0x22   : > { %p1464_p2 = pneg %p1463_p1 }
  0x24   : > { %p1469_p4 = pnand %p1467_p3, %p1464_p2 }
  0x26   : > { %1472 = shalt.err (!%p1469_p4)
}
  0x27   : > { %s1473_s19 = scalar_lea.vmem %s232_s15, 16  ;;  %s1480_s21 = scalar_lea.vmem %s232_s15, 32 }
  0x28   : > { %p1474_p7 = scmp.ne.s32.totalorder %s232_s15, %s1473_s19  ;;  %p1481_p9 = scmp.lt.s32.totalorder %s232_s15, %s232_s15 }
  0x29   : > { %p1482_p6 = scmp.lt.s32.totalorder %s1480_s21, %s1473_s19 }
  0x2a   : > { %p1476_p8 = pnand %p1474_p7, %p1738_p0 }
  0x2b   : > { %p1483_p5 = por %p1482_p6, %p1481_p9 }
  0x2c   : > { %p1477_p11 = pneg %p1476_p8 }
  0x2e   : > { %p1484_p10 = pnand %p1483_p5, %p1477_p11 }
  0x30   : > { %1487 = shalt.err (!%p1484_p10)
}
  0x31   : > { %1397 = dma.hbm_to_vmem [thread:$0]  (!%p1722_p12), %s1997_s2, 16, %s232_s15, [#allocation6]  }
  0x32   : > { %s1488_s14 = scalar_lea.hbm %s1981_s1, 256 }
  0x33   : > { %p1489_p13 = scmp.ne.s32.totalorder %s1981_s1, %s1488_s14  ;;  %p1495_p5 = scmp.lt.u32.totalorder %s1488_s14, %s1981_s1 }
  0x35   : > { %p1491_p1 = pnand %p1489_p13, %p1738_p0 }
  0x37   : > { %p1492_p6 = pneg %p1491_p1 }
  0x39   : > { %p1497_p9 = pnand %p1495_p5, %p1492_p6 }
  0x3b   : > { %1500 = shalt.err (!%p1497_p9)
}
  0x3c   : > { %s1501_s15 = scalar_lea.vmem %s1726_s17, 256  ;;  %p1509_p4 = scmp.lt.s32.totalorder %s1726_s17, %s1726_s17 }
  0x3d   : > { %p1502_p10 = scmp.ne.s32.totalorder %s1726_s17, %s1501_s15  ;;  %p1510_p7 = scmp.lt.s32.totalorder %s1501_s15, %s1501_s15 }
  0x3f   : > { %p1504_p2 = pnand %p1502_p10, %p1738_p0  ;;  %p1511_p8 = por %p1510_p7, %p1509_p4 }
  0x41   : > { %p1505_p3 = pneg %p1504_p2 }
  0x43   : > { %p1512_p11 = pnand %p1511_p8, %p1505_p3 }
  0x45   : > { %1515 = shalt.err (!%p1512_p11)
}
  0x46   : > { %s1619_s10 = smov 128   ;;  %s1620_s22 = smov 8  }
  0x47   : > { %1394 = dma.hbm_to_vmem [thread:$0]  (!%p1722_p12), %s1981_s1, 256, %s1726_s17, [#allocation3], %s1619_s10, %s1619_s10, %s1620_s22  }
  0x48   : > { %s1516_s16 = scalar_lea.hbm %s1983_s3, 3072 }
  0x49   : > { %p1517_p13 = scmp.ne.s32.totalorder %s1983_s3, %s1516_s16  ;;  %p1523_p5 = scmp.lt.u32.totalorder %s1516_s16, %s1983_s3 }
  0x4b   : > { %p1519_p1 = pnand %p1517_p13, %p1738_p0 }
  0x4d   : > { %p1520_p6 = pneg %p1519_p1 }
  0x4f   : > { %p1525_p9 = pnand %p1523_p5, %p1520_p6 }
  0x51   : > { %1528 = shalt.err (!%p1525_p9)
}
  0x52   : > { %s1529_s29 = scalar_lea.vmem %s242_s20, 3072  ;;  %p1537_p4 = scmp.lt.s32.totalorder %s242_s20, %s242_s20 }
  0x53   : > { %p1530_p10 = scmp.ne.s32.totalorder %s242_s20, %s1529_s29  ;;  %p1538_p7 = scmp.lt.s32.totalorder %s1529_s29, %s1529_s29 }
  0x55   : > { %p1532_p2 = pnand %p1530_p10, %p1738_p0  ;;  %p1539_p8 = por %p1538_p7, %p1537_p4 }
  0x57   : > { %p1533_p3 = pneg %p1532_p2 }
  0x59   : > { %p1540_p11 = pnand %p1539_p8, %p1533_p3 }
  0x5b   : > { %1543 = shalt.err (!%p1540_p11)
}
  0x5c   : > { %1400 = dma.hbm_to_vmem [thread:$0]  (!%p1722_p12), %s1983_s3, 3072, %s242_s20, [#allocation6], %s1619_s10, %s1619_s10, %s1620_s22  }
  0x5d   : > { %p1999_p13 = scmp.ne.s32.totalorder %s1995_s13, 0 }
  0x5e   : > { %p2000_p1 = scmp.eq.s32.totalorder (!%p1999_p13), %s1686_s28, 0 }
  0x5f   : > { %273 = sbr.rel (%p1999_p13) target bundleno = 3104 (0xc20), region = 48 }
  0x66   : > { %1589 = dma.done.wait (%p2000_p1), [#allocation3], 256   ;;  %p2001_p0 = pmov %p2000_p1 }
  0x68   : > { %1591 = vsyncadd (%p2001_p0), [#allocation3], 4294967040  ;;  %p2002_p6 = pmov %p2001_p0 }
  0x69   : > { %p2003_p5 = pmov %p2001_p0 }
  0x6a   : > { %1593 = dma.done.wait (%p2002_p6), [#allocation6], 3088  }
  0x6b   : > { %1595 = vsyncadd (%p2003_p5), [#allocation6], 4294964208  ;;  %p312_p9 = scmp.lt.s32.totalorder %s1686_s28, 1  ;;  %v1621_v0 = vmov 0.0|0.0   ;;  %vm1622_vm0 = vmmov 0   ;;  %v1623_v1 = vmov 0.0   ;;  %v415_v16 = vlaneseq }
  0x6c   : > { %1332 = vmatprep.subr.bf16.mxu0 %v1621_v0  ;;  %1252 = vmatprep.mubr.msk.f32.mxu0 %vm1622_vm0, %v1623_v1  ;;  %v316_v2 = vld [vmem:[#allocation2] sm:$0xff]  ;;  %v317_v3 = vld [vmem:[#allocation2 + $0x8] sm:$0xff]  ;;  %v400_v5 = vld [vmem:[#allocation7] sm:$0xff]  ;;  %vm326_vm1 = vcmask 130048   ;;  %vm419_vm2 = vcmask 261120   ;;  %s1207_s10 = sshll.u32 %s1686_s28, 7 }
  0x6d   : > { %s313_s2 = scalar_select %p312_p9, %s1686_s28, 1  ;;  %1335 = vmatprep.subr.bf16.mxu1 %v1621_v0  ;;  %1263 = vmatprep.mubr.msk.f32.mxu1 %vm1622_vm0, %v1623_v1  ;;  %v1333_v4 = vpack.c.bf16 %v317_v3, %v316_v2  ;;  %v401_v6 = vld [vmem:[#allocation7 + $0x8] sm:$0xff]  ;;  %v402_v9 = vld [vmem:[#allocation7 + $0x10] sm:$0xff]  ;;  %v403_v10 = vld [vmem:[#allocation7 + $0x18] sm:$0xff]  ;;  %v1825_v17 = vshrl.u32 %v415_v16, 7 }
  0x6e   : > { %v1336_v7 = vpack.c.bf16 %v401_v6, %v400_v5  ;;  %v1339_v11 = vpack.c.bf16 %v403_v10, %v402_v9  ;;  %v1195_v12 = vld [vmem:[#allocation5] ss:$0 sm:$0xff]  ;;  %v1831_v19 = vld [vmem:[%s1984_s4] sm:$0x7f]  ;;  %v405_v31 = vld [vmem:[#allocation7 + $0x20] sm:$0xff]  ;;  %s1938_s19 = scalar_lea.hbm %s1987_s7, %s1207_s10  ;;  %p2004_p10 = scmp.ne.s32.totalorder %s1993_s11, 0 }
  0x6f   : > { %s1194_s13 = sshll.u32 %s313_s2, 3  ;;  %1334 = vmatpush3.bf16.msra.mxu0 %v1333_v4  ;;  %v417_v18 = vsub.s32 0, %v1825_v17  ;;  %v406_v32 = vld [vmem:[#allocation7 + $0x28] sm:$0xff]  ;;  %v407_v34 = vld [vmem:[#allocation7 + $0x30] sm:$0xff]  ;;  %v408_v35 = vld [vmem:[#allocation7 + $0x38] sm:$0xff]  ;;  %v510_v43 = vsub.s32 3, %v1825_v17 }
  0x70   : > { %s315_s9 = scalar_lea.vmem %s1980_s0, %s1194_s13  ;;  %1337 = vmatpush3.bf16.msra.mxu1 %v1336_v7  ;;  %1341 = vmatprep.subr.bf16.mxu0 %v1621_v0  ;;  %v1342_v33 = vpack.c.bf16 %v406_v32, %v405_v31  ;;  %v1345_v36 = vpack.c.bf16 %v408_v35, %v407_v34  ;;  %v410_v37 = vld [vmem:[#allocation7 + $0x40] sm:$0xff]  ;;  %v411_v38 = vld [vmem:[#allocation7 + $0x48] sm:$0xff]  ;;  %v515_v44 = vsub.s32 4, %v1825_v17  ;;  %v412_v51 = vld [vmem:[#allocation7 + $0x50] sm:$0xff]  ;;  %v520_v54 = vsub.s32 1, %v1825_v17  ;;  %s309_s13 = sand.u32 1, %s1606_s25  }
  0x71   : > { %v318_v8 = vld [vmem:[%s315_s9] sm:$0xff]  ;;  %1338 = vmatprep.subr.bf16.mxu1 %v1621_v0  ;;  %v418_v20 = vrot.slane %v1831_v19, %v417_v18  ;;  %v1348_v39 = vpack.c.bf16 %v411_v38, %v410_v37  ;;  %v511_v45 = vrot.slane %v1831_v19, %v510_v43  ;;  %v413_v52 = vld [vmem:[#allocation7 + $0x58] sm:$0xff]  ;;  %v598_v60 = vsub.s32 2, %v1825_v17  ;;  %v698_v10 = vld [vmem:[#allocation7 + $0x60] sm:$0xff]  ;;  %s1193_s18 = sshll.u32 %s309_s13, 3  ;;  %s1080_s21 = scalar_lea.sflag [#allocation4], %s309_s13 }
  0x72   : > { %1253 = vmatmul.mubr.msk.f32.vlgmr.msra.gmra.mrb[0].mxu0 %vm326_vm1, %v318_v8  ;;  %v516_v48 = vrot.slane %v1831_v19, %v515_v44  ;;  %v1351_v53 = vpack.c.bf16 %v413_v52, %v412_v51  ;;  %v521_v55 = vrot.slane %v1831_v19, %v520_v54  ;;  %s311_s22 = scalar_lea.vmem [#allocation8], %s1193_s18  ;;  %s1624_s28 = smov [#allocation8]  }
  0x73   : > { %1274 = vmatprep.mubr.msk.f32.mxu0 %vm1622_vm0, %v1623_v1  ;;  %1343 = vmatpush3.bf16.msra.mxu0 %v1342_v33  ;;  %v599_v61 = vrot.slane %v1831_v19, %v598_v60  ;;  %s1093_s8 = sshll.u32 %s311_s22, 4  ;;  %s1548_s29 = sshll.u32 %s1624_s28, 4  ;;  %s1940_s8 = int_to_ptr.vmem [resolvable:$true] %s1093_s8  ;;  %s1549_s29 = int_to_ptr.vmem [resolvable:$false] %s1548_s29 }
  0x74   : > { %1340 = vmatpush3.bf16.msra.mxu1 %v1339_v11  ;;  %1344 = vmatprep.subr.bf16.mxu0 %v1621_v0  ;;  %v699_v11 = vld [vmem:[#allocation7 + $0x68] sm:$0xff]  ;;  %s1544_s15 = scalar_lea.vmem %s1940_s8, 128  ;;  %s1550_s17 = scalar_lea.vmem %s1549_s29, 256 }
  0x75   : > { %1347 = vmatprep.subr.bf16.mxu1 %v1621_v0  ;;  %p1545_p12 = scmp.ne.s32.totalorder %s1940_s8, %s1544_s15  ;;  %p1551_p4 = scmp.lt.s32.totalorder %s1940_s8, %s1549_s29 }
  0x76   : > { %p1552_p7 = scmp.lt.s32.totalorder %s1550_s17, %s1544_s15 }
  0x77   : > { %1346 = vmatpush3.bf16.msra.mxu0 %v1345_v36  ;;  %p1546_p2 = pnand %p1545_p12, %p2004_p10 }
  0x78   : > { %1353 = vmatprep.subr.bf16.mxu0 %v1621_v0  ;;  %p1553_p8 = por %p1552_p7, %p1551_p4 }
  0x79   : > { %p1547_p3 = pneg %p1546_p2 }
  0x7b   : > { %p1554_p11 = pnand %p1553_p8, %p1547_p3 }
 0x145   : > { %v396_v13 = vpop.f32.mrb[0].mxu0 }
 0x146   : > { %v397_v14 = vadd.f32 %v1195_v12, %v396_v13  ;;  %v1254_v15 = vpop.f32.mrb[1].mxu0  ;;  %v1354_v12 = vpack.c.bf16 %v699_v11, %v698_v10  ;;  %v700_v13 = vld [vmem:[#allocation7 + $0x70] sm:$0xff] }
 0x148   : > { %1264 = vmatmul.mubr.msk.f32.vlgmr.msra.gmra.mrb[0].mxu1 %vm419_vm2, %v397_v14 }
 0x149   : > { %1285 = vmatprep.mubr.msk.f32.mxu1 %vm1622_vm0, %v1623_v1  ;;  %1349 = vmatpush3.bf16.msra.mxu1 %v1348_v39 }
 0x14a   : > { %1350 = vmatprep.subr.bf16.mxu1 %v1621_v0 }
 0x14d   : > { %1352 = vmatpush3.bf16.msra.mxu1 %v1351_v53 }
 0x14e   : > { %1359 = vmatprep.subr.bf16.mxu1 %v1621_v0 }
 0x21b   : > { %v489_v21 = vpop.f32.mrb[0].mxu1 }
 0x21c   : > { %v490_v22 = vadd.f32 %v489_v21, %v418_v20  ;;  %v1265_v23 = vpop.f32.mrb[1].mxu1 }
 0x21d   : > { %v694_v23 = vsub.s32 6, %v1825_v17 }
 0x21e   : > { %v493_v24 = vadd.f32 %v490_v22, %v397_v14  ;;  %v701_v14 = vld [vmem:[#allocation7 + $0x78] sm:$0xff]  ;;  %v689_v22 = vsub.s32 5, %v1825_v17 }
 0x21f   : > { %v1357_v15 = vpack.c.bf16 %v701_v14, %v700_v13 }
 0x220   : > { %v494_v25 = vsel %vm419_vm2, %v493_v24, 0.0 }
 0x221   : > { %495 = vadd.xlane.f32.xlu0 %v494_v25 }
 0x2ae   : > { %v496_v26 = vpop.xlane.xlu0 %495 }
 0x2af   : > { %v498_v27 = vmul.f32 0.03125, %v496_v26 }
 0x2b1   : > { %v499_v28 = vsub.f32 %v493_v24, %v498_v27  ;;  %v690_v24 = vrot.slane %v1831_v19, %v689_v22  ;;  %v695_v27 = vrot.slane %v1831_v19, %v694_v23 }
 0x2b3   : > { %v500_v29 = vmul.f32 %v499_v28, %v499_v28 }
 0x2b5   : > { %v501_v30 = vsel %vm419_vm2, %v500_v29, 0.0 }
 0x2b6   : > { %502 = vadd.xlane.f32.xlu0 %v501_v30  ;;  %v1882_v30 = vld [vmem:[%s1984_s4 + $0x8] sm:$0x7f] }
 0x2b7   : > { %v717_v31 = vrot.slane %v1882_v30, %v417_v18  ;;  %v705_v18 = vld [vmem:[#allocation7 + $0x90] sm:$0xff] }
 0x343   : > { %v503_v40 = vpop.xlane.xlu0 %502 }
 0x344   : > { %v504_v41 = vmul.f32 0.03125, %v503_v40 }
 0x346   : > { %v505_v42 = vadd.f32 1e-05, %v504_v41  ;;  %v703_v41 = vld [vmem:[#allocation7 + $0x80] sm:$0xff] }
 0x348   : > { %1452 = vrsqrt.f32 %v505_v42  ;;  %v704_v42 = vld [vmem:[#allocation7 + $0x88] sm:$0xff] }
 0x352   : > { %v1453_v46 = vpop.eup %1452 }
 0x353   : > { %v507_v47 = vmul.f32 %v1453_v46, %v499_v28  ;;  %v706_v46 = vld [vmem:[#allocation7 + $0x98] sm:$0xff] }
 0x355   : > { %v512_v49 = vmul.f32 %v511_v45, %v507_v47  ;;  %v1360_v45 = vpack.c.bf16 %v704_v42, %v703_v41  ;;  %v1363_v47 = vpack.c.bf16 %v706_v46, %v705_v18 }
 0x357   : > { %v517_v50 = vadd.f32 %v516_v48, %v512_v49  ;;  %v708_v48 = vld [vmem:[#allocation7 + $0xa0] sm:$0xff]  ;;  %v709_v49 = vld [vmem:[#allocation7 + $0xa8] sm:$0xff] }
 0x359   : > { %1275 = vmatmul.mubr.msk.f32.vlgmr.msra.gmra.mrb[2].mxu0 %vm419_vm2, %v517_v50 }
 0x35a   : > { %1296 = vmatprep.mubr.msk.f32.mxu0 %vm1622_vm0, %v1623_v1  ;;  %1355 = vmatpush3.bf16.msra.mxu0 %v1354_v12 }
 0x35b   : > { %1356 = vmatprep.subr.bf16.mxu0 %v1621_v0 }
 0x35e   : > { %1358 = vmatpush3.bf16.msra.mxu0 %v1357_v15  ;;  %v994_v15 = vld [vmem:[%s1985_s5] sm:$0xff] }
 0x35f   : > { %1365 = vmatprep.subr.bf16.mxu0 %v1621_v0 }
 0x42c   : > { %v591_v56 = vpop.f32.mrb[2].mxu0 }
 0x42d   : > { %v592_v57 = vadd.f32 %v591_v56, %v521_v55  ;;  %v1276_v58 = vpop.f32.mrb[3].mxu0  ;;  %v808_v55 = vrot.slane %v1882_v30, %v510_v43  ;;  %v818_v43 = vrot.slane %v1882_v30, %v520_v54 }
 0x42e   : > { %v813_v58 = vrot.slane %v1882_v30, %v515_v44  ;;  %v896_v44 = vrot.slane %v1882_v30, %v598_v60  ;;  %v995_v60 = vld [vmem:[%s1985_s5 + $0x8] sm:$0xff] }
 0x42f   : > { %v595_v59 = vmax.f32 %v592_v57, 0.0 }
 0x431   : > { %1286 = vmatmul.mubr.msk.f32.vlgmr.msra.gmra.mrb[2].mxu1 %vm419_vm2, %v595_v59 }
 0x432   : > { %1307 = vmatprep.mubr.msk.f32.mxu1 %vm1622_vm0, %v1623_v1  ;;  %1361 = vmatpush3.bf16.msra.mxu1 %v1360_v45 }
 0x433   : > { %1362 = vmatprep.subr.bf16.mxu1 %v1621_v0 }
 0x436   : > { %1364 = vmatpush3.bf16.msra.mxu1 %v1363_v47 }
 0x437   : > { %1371 = vmatprep.subr.bf16.mxu1 %v1621_v0 }
 0x504   : > { %v669_v62 = vpop.f32.mrb[2].mxu1 }
 0x505   : > { %v670_v63 = vadd.f32 %v669_v62, %v599_v61  ;;  %v1287_v2 = vpop.f32.mrb[3].mxu1  ;;  %v710_v62 = vld [vmem:[#allocation7 + $0xb0] sm:$0xff] }
 0x507   : > { %v673_v3 = vadd.f32 %v670_v63, %v517_v50  ;;  %v1366_v50 = vpack.c.bf16 %v709_v49, %v708_v48  ;;  %v711_v63 = vld [vmem:[#allocation7 + $0xb8] sm:$0xff] }
 0x508   : > { %v1369_v2 = vpack.c.bf16 %v711_v63, %v710_v62 }
 0x509   : > { %v674_v4 = vsel %vm419_vm2, %v673_v3, 0.0 }
 0x50a   : > { %675 = vadd.xlane.f32.xlu1 %v674_v4 }
 0x597   : > { %v676_v5 = vpop.xlane.xlu1 %675 }
 0x598   : > { %v677_v6 = vmul.f32 0.03125, %v676_v5 }
 0x59a   : > { %v678_v7 = vsub.f32 %v673_v3, %v677_v6 }
 0x59c   : > { %v679_v8 = vmul.f32 %v678_v7, %v678_v7 }
 0x59e   : > { %v680_v9 = vsel %vm419_vm2, %v679_v8, 0.0 }
 0x59f   : > { %681 = vadd.xlane.f32.xlu1 %v680_v9 }
 0x62c   : > { %v682_v16 = vpop.xlane.xlu1 %681 }
 0x62d   : > { %v683_v20 = vmul.f32 0.03125, %v682_v16  ;;  %v1372_v16 = vpack.c.bf16 %v995_v60, %v994_v15 }
 0x62f   : > { %v684_v21 = vadd.f32 1e-05, %v683_v20  ;;  %v996_v20 = vld [vmem:[%s1985_s5 + $0x10] sm:$0xff] }
 0x631   : > { %1454 = vrsqrt.f32 %v684_v21  ;;  %v997_v21 = vld [vmem:[%s1985_s5 + $0x18] sm:$0xff] }
 0x63b   : > { %v1455_v25 = vpop.eup %1454 }
 0x63c   : > { %v686_v26 = vmul.f32 %v1455_v25, %v678_v7 }
 0x63e   : > { %v691_v28 = vmul.f32 %v690_v24, %v686_v26  ;;  %v1375_v24 = vpack.c.bf16 %v997_v21, %v996_v20 }
 0x640   : > { %v696_v29 = vadd.f32 %v695_v27, %v691_v28 }
 0x642   : > { %1297 = vmatmul.mubr.msk.f32.vlgmr.msra.gmra.mrb[4].mxu0 %vm419_vm2, %v696_v29 }
 0x643   : > { %1318 = vmatprep.mubr.msk.f32.mxu0 %vm1622_vm0, %v1623_v1  ;;  %1367 = vmatpush3.bf16.msra.mxu0 %v1366_v50 }
 0x644   : > { %1368 = vmatprep.subr.bf16.mxu0 %v1621_v0 }
 0x647   : > { %1370 = vmatpush3.bf16.msra.mxu0 %v1369_v2 }
 0x715   : > { %v787_v32 = vpop.f32.mrb[4].mxu0 }
 0x716   : > { %v788_v33 = vadd.f32 %v787_v32, %v717_v31  ;;  %v1298_v34 = vpop.f32.mrb[5].mxu0  ;;  %v992_v31 = vrot.slane %v1882_v30, %v694_v23 }
 0x717   : > { %v1204_v34 = vld [vmem:[%s1986_s6] ss:$0 sm:$0xff] }
 0x718   : > { %v791_v19 = vadd.f32 %v788_v33, %v696_v29 }
 0x71a   : > { %v792_v35 = vsel %vm419_vm2, %v791_v19, 0.0 }
 0x71b   : > { %793 = vadd.xlane.f32.xlu0 %v792_v35 }
 0x7a8   : > { %v794_v36 = vpop.xlane.xlu0 %793 }
 0x7a9   : > { %v795_v37 = vmul.f32 0.03125, %v794_v36 }
 0x7ab   : > { %v796_v38 = vsub.f32 %v791_v19, %v795_v37 }
 0x7ad   : > { %v797_v39 = vmul.f32 %v796_v38, %v796_v38 }
 0x7af   : > { %v798_v40 = vsel %vm419_vm2, %v797_v39, 0.0 }
 0x7b0   : > { %799 = vadd.xlane.f32.xlu1 %v798_v40 }
 0x83d   : > { %v800_v51 = vpop.xlane.xlu1 %799 }
 0x83e   : > { %v801_v52 = vmul.f32 0.03125, %v800_v51 }
 0x840   : > { %v802_v53 = vadd.f32 1e-05, %v801_v52 }
 0x842   : > { %1456 = vrsqrt.f32 %v802_v53 }
 0x84c   : > { %v1457_v56 = vpop.eup %1456 }
 0x84d   : > { %v804_v57 = vmul.f32 %v1457_v56, %v796_v38 }
 0x84f   : > { %v809_v59 = vmul.f32 %v808_v55, %v804_v57 }
 0x851   : > { %v814_v61 = vadd.f32 %v813_v58, %v809_v59 }
 0x853   : > { %1308 = vmatmul.mubr.msk.f32.vlgmr.msra.gmra.mrb[4].mxu1 %vm419_vm2, %v814_v61 }
 0x854   : > { %1329 = vmatprep.mubr.msk.f32.mxu1 %vm1622_vm0, %v1623_v1  ;;  %1373 = vmatpush3.bf16.msra.mxu1 %v1372_v16 }
 0x855   : > { %1374 = vmatprep.subr.bf16.mxu1 %v1621_v0  ;;  %v987_v0 = vrot.slane %v1882_v30, %v689_v22 }
 0x858   : > { %1376 = vmatpush3.bf16.msra.mxu1 %v1375_v24 }
 0x926   : > { %v888_v3 = vpop.f32.mrb[4].mxu1 }
 0x927   : > { %v889_v4 = vadd.f32 %v888_v3, %v818_v43  ;;  %v1309_v5 = vpop.f32.mrb[5].mxu1 }
 0x929   : > { %v892_v6 = vmax.f32 %v889_v4, 0.0 }
 0x92b   : > { %1319 = vmatmul.mubr.msk.f32.vlgmr.msra.gmra.mrb[6].mxu0 %vm419_vm2, %v892_v6 }
 0x9fe   : > { %v966_v7 = vpop.f32.mrb[6].mxu0 }
 0x9ff   : > { %v967_v1 = vadd.f32 %v966_v7, %v896_v44  ;;  %v1320_v8 = vpop.f32.mrb[7].mxu0 }
 0xa01   : > { %v970_v9 = vadd.f32 %v967_v1, %v814_v61 }
 0xa03   : > { %v971_v10 = vsel %vm419_vm2, %v970_v9, 0.0 }
 0xa04   : > { %972 = vadd.xlane.f32.xlu0 %v971_v10 }
 0xa91   : > { %v973_v11 = vpop.xlane.xlu0 %972 }
 0xa92   : > { %v974_v12 = vmul.f32 0.03125, %v973_v11 }
 0xa94   : > { %v975_v54 = vsub.f32 %v970_v9, %v974_v12 }
 0xa96   : > { %v976_v13 = vmul.f32 %v975_v54, %v975_v54 }
 0xa98   : > { %v977_v14 = vsel %vm419_vm2, %v976_v13, 0.0 }
 0xa99   : > { %978 = vadd.xlane.f32.xlu1 %v977_v14 }
 0xb26   : > { %v979_v25 = vpop.xlane.xlu1 %978 }
 0xb27   : > { %v980_v26 = vmul.f32 0.03125, %v979_v25 }
 0xb29   : > { %v981_v27 = vadd.f32 1e-05, %v980_v26 }
 0xb2b   : > { %1458 = vrsqrt.f32 %v981_v27 }
 0xb35   : > { %v1459_v28 = vpop.eup %1458 }
 0xb36   : > { %v983_v29 = vmul.f32 %v1459_v28, %v975_v54 }
 0xb38   : > { %v988_v32 = vmul.f32 %v987_v0, %v983_v29 }
 0xb3a   : > { %v993_v33 = vadd.f32 %v992_v31, %v988_v32 }
 0xb3c   : > { %1330 = vmatmul.mubr.msk.f32.vlgmr.msra.gmra.mrb[6].mxu1 %vm419_vm2, %v993_v33 }
 0xc0f   : > { %v1074_v22 = vpop.f32.mrb[6].mxu1 }
 0xc10   : > { %v1075_v19 = vadd.f32 %v1204_v34, %v1074_v22  ;;  %v1331_v35 = vpop.f32.mrb[7].mxu1 }
 0xc12   : > { %1078 = vst [vmem:[%s311_s22] sm:$0xff] %v1075_v19 }
 0xc13   : > { %1557 = shalt.err (!%p1554_p11)
}
 0xc14   : > { %s1558_s23 = scalar_lea.hbm %s1938_s19, 128  ;;  %s1562_s18 = scalar_lea.hbm %s1987_s7, 256 }
 0xc15   : > { %p1559_p13 = scmp.ne.s32.totalorder %s1938_s19, %s1558_s23  ;;  %p1563_p6 = scmp.lt.u32.totalorder %s1938_s19, %s1987_s7 }
 0xc16   : > { %p1564_p5 = scmp.lt.u32.totalorder %s1562_s18, %s1558_s23  ;;  %p1566_p12 = scmp.lt.u32.totalorder %s1558_s23, %s1938_s19 }
 0xc17   : > { %p1560_p1 = pnand %p1559_p13, %p2004_p10 }
 0xc18   : > { %p1565_p9 = por %p1564_p5, %p1563_p6 }
 0xc19   : > { %p1561_p0 = pneg %p1560_p1 }
 0xc1a   : > { %p1567_p2 = por %p1566_p12, %p1565_p9 }
 0xc1c   : > { %p1568_p3 = pnand %p1567_p2, %p1561_p0 }
 0xc1e   : > { %1571 = shalt.err (!%p1568_p3)
}
 0xc1f   : > { %1389 = dma.vmem_to_hbm [thread:$0]  (%p2004_p10), %s1940_s8, 128, %s1938_s19, %s1080_s21  }
 0xc20 PF: > { %p1411_p4 = scmp.ge.s32.totalorder %s1614_s27, 2  ;;  %s1105_s10 = sand.u32 1, %s1602_s24  }
 0xc21   : > { %p2005_p7 = scmp.ne.s32.totalorder %s1994_s12, 0  ;;  %s1106_s22 = scalar_lea.sflag [#allocation4], %s1105_s10 }
 0xc23   : > { %p1402_p8 = pnand %p1411_p4, %p2005_p7 }
 0xc25   : > { %1597 = dma.done.wait (!%p1402_p8), %s1106_s22, 128  }
 0xc26   : > { %1599 = vsyncadd (!%p1402_p8), %s1106_s22, 4294967168  ;;  %s2006_s14 = sld [smem:[#allocation12_spill]]  ;;  %p19_p11 = scmp.ge.s32.totalorder %s1690_s30, 4  }
 0xc27   : > { %s2007_s24 = smov %s1606_s25  ;;  %s2008_s25 = smov %s1610_s26 }
 0xc28   : > { %s2010_s27 = smov %s1690_s30  ;;  %21 = sbr.rel (!%p19_p11) target bundleno = 7 (0x7), region = 102 }
 0xc2c   : > { %s2009_s26 = smov %s2006_s14 }
 0xc2f   :  { %1111 = vsyncpa [#allocation3], 1 }
 0xc30   :  { %1113 = vsyncpa [#allocation3 + $0x1], 1 }
 0xc31   :  { %1114 = vsyncpa [#allocation6], 1 }
 0xc32   :  { %1115 = vsyncpa [#allocation4], 1 }
 0xc33   :  { %1117 = vsyncpa [#allocation4 + $0x1], 1 }

</bundles_post_ra>
